<compile_context>
chip_gen: v7x
topology: tpu7x:2x2x1
jax: 0.10.0
libtpu: 0.0.40
codegen_flags: <defaults>
</compile_context>

<pallas_src>
import jax
import jax.numpy as jnp
from jax.experimental import pallas as pl
from jax.experimental.pallas import tpu as pltpu

HIDDEN = 100          # PyTorch hidden_dim
HIDDEN_PAD = 128      # lane-aligned hidden dim used inside the kernel
LANE = 128


def _round_up(n, m):
    return ((n + m - 1) // m) * m


def _chip_kind():
    try:
        return jax.devices()[0].device_kind.lower()
    except Exception:
        return ""


def _num_tensorcores(kind):
    # v7x (and megacore v4) expose 2 TensorCores per device; v5e/v6e have 1.
    if any(tag in kind for tag in ("v7", "7x", "v4")):
        return 2
    return 1


def _bf16_elementwise_ok(kind):
    # v6e/v7x have bf16 VPU/EUP; v5e (and older) do not -> keep f32 softplus.
    if not kind:
        return False
    return not any(tag in kind for tag in ("v2", "v3", "v4", "v5"))


def _softplus(x):
    # nn.Softplus(beta=1, threshold=20): x if x > 20 else log1p(exp(x)).
    # The select discards the (possibly inf) unselected branch, so no clamp needed.
    return jnp.where(x > 20.0, x, jnp.log1p(jnp.exp(x)))


def _make_kernel(ew_dtype):
    """Kernel factory; ew_dtype is the elementwise (softplus) dtype."""

    def mlp_kernel(t_ref, w1_ref, b1_ref, w2_ref, b2_ref, w3_ref, b3_ref, o_ref):
        mm_dtype = w1_ref.dtype               # f32 or bf16 (MXU input dtype)
        x = t_ref[...].astype(mm_dtype)

        # Layer 1: K = D_in is tiny, so this MXU pass is mostly wasted but it
        # hides under the EUP-bound softplus; keeping it on the MXU is simpler
        # than unrolling 4 broadcast MADs on the VPU.
        h = jnp.dot(x, w1_ref[...], preferred_element_type=jnp.float32) + b1_ref[...]
        h = _softplus(h.astype(ew_dtype))     # bf16 on v6e/v7x bf16 path, else f32

        h = jnp.dot(h.astype(mm_dtype), w2_ref[...],
                    preferred_element_type=jnp.float32) + b2_ref[...]
        h = _softplus(h.astype(ew_dtype))

        o = jnp.dot(h.astype(mm_dtype), w3_ref[...],
                    preferred_element_type=jnp.float32) + b3_ref[...]
        o_ref[...] = o.astype(o_ref.dtype)    # lane-dense (blk, 128k) store

    return mlp_kernel


def pad_params(params, *, matmul_dtype=jnp.float32):
    """Pad/cast PyTorch-shaped params to lane-aligned TPU shapes ONCE.

    Hoisted out of neural_ode_forward so an ODE solver does not re-pad and
    re-stream the weights on every RK-stage evaluation.
    """
    w1, b1, w2, b2, w3, b3 = params
    d_in = w1.shape[0]
    d_out = w3.shape[1]
    d_out_pad = _round_up(d_out, LANE)
    hp = HIDDEN_PAD - w1.shape[1]

    w1p = jnp.pad(w1, ((0, 0), (0, hp))).astype(matmul_dtype)
    b1p = jnp.pad(b1.reshape(1, -1), ((0, 0), (0, hp))).astype(jnp.float32)
    w2p = jnp.pad(w2, ((0, hp), (0, hp))).astype(matmul_dtype)
    b2p = jnp.pad(b2.reshape(1, -1), ((0, 0), (0, hp))).astype(jnp.float32)
    w3p = jnp.pad(w3, ((0, hp), (0, d_out_pad - d_out))).astype(matmul_dtype)
    b3p = jnp.pad(b3.reshape(1, -1), ((0, 0), (0, d_out_pad - d_out))).astype(jnp.float32)

    return {
        "tensors": (w1p, b1p, w2p, b2p, w3p, b3p),
        "d_in": int(d_in),
        "d_out": int(d_out),
        "d_out_pad": int(d_out_pad),
        "matmul_dtype": jnp.dtype(matmul_dtype),
    }


def neural_ode_forward(x, t, padded, *, block_b=1024, softplus_dtype=None,
                       out_dtype=None, single_buffer_weights=True):
    """Pallas implementation of NeuralODEModel.forward(x, t).

    `padded` is the output of pad_params (pre-padded, pre-cast weights).
    """
    del x  # PyTorch forward overwrites x with t; only t is used.
    w1p, b1p, w2p, b2p, w3p, b3p = padded["tensors"]
    d_in, d_out, d_out_pad = padded["d_in"], padded["d_out"], padded["d_out_pad"]
    mm_dtype = padded["matmul_dtype"]
    B = t.shape[0]
    assert t.shape[1] == d_in

    kind = _chip_kind()
    n_cores = _num_tensorcores(kind)
    if softplus_dtype is None:
        softplus_dtype = (jnp.bfloat16
                          if (mm_dtype == jnp.bfloat16 and _bf16_elementwise_ok(kind))
                          else jnp.float32)
    if out_dtype is None:
        out_dtype = jnp.bfloat16 if mm_dtype == jnp.bfloat16 else t.dtype

    # --- batch tiling: big sublane-aligned tiles; even >=2-step grid only on
    #     multi-TensorCore chips (single-TC chips run one maximal block). ---
    blk_cap = max(8, _round_up(min(block_b, _round_up(B, 8)), 8))
    steps = pl.cdiv(B, blk_cap)
    if n_cores >= 2:
        steps = max(steps, n_cores)
        if steps % n_cores:
            steps += n_cores - (steps % n_cores)
    blk = max(8, _round_up(pl.cdiv(B, steps), 8))
    B_pad = blk * steps
    t_p = jnp.pad(t, ((0, B_pad - B), (0, 0))) if B_pad != B else t

    flops = 2 * B_pad * (d_in * HIDDEN_PAD + HIDDEN_PAD * HIDDEN_PAD
                         + HIDDEN_PAD * d_out_pad)
    transcendentals = 4 * B_pad * HIDDEN_PAD  # exp + log1p, two softplus layers
    mm_size = jnp.dtype(mm_dtype).itemsize
    bytes_accessed = (
        B_pad * d_in * t.dtype.itemsize
        + B_pad * d_out_pad * jnp.dtype(out_dtype).itemsize
        + (w1p.size + w2p.size + w3p.size) * mm_size
        + (b1p.size + b2p.size + b3p.size) * 4
    )

    kernel = _make_kernel(jnp.dtype(softplus_dtype))

    def run(weight_mode):
        def wspec(shape):
            if weight_mode is None:
                return pl.BlockSpec(shape, lambda i: (0, 0))
            return pl.BlockSpec(shape, lambda i: (0, 0), pipeline_mode=weight_mode)

        return pl.pallas_call(
            kernel,
            out_shape=jax.ShapeDtypeStruct((B_pad, d_out_pad), out_dtype),
            grid_spec=pltpu.PrefetchScalarGridSpec(
                num_scalar_prefetch=0,
                grid=(steps,),
                in_specs=[
                    pl.BlockSpec((blk, d_in), lambda i: (i, 0)),   # t tile
                    wspec((d_in, HIDDEN_PAD)),                     # W1 (resident)
                    wspec((1, HIDDEN_PAD)),                        # b1
                    wspec((HIDDEN_PAD, HIDDEN_PAD)),               # W2
                    wspec((1, HIDDEN_PAD)),                        # b2
                    wspec((HIDDEN_PAD, d_out_pad)),                # W3
                    wspec((1, d_out_pad)),                         # b3
                ],
                out_specs=pl.BlockSpec((blk, d_out_pad), lambda i: (i, 0)),
            ),
            compiler_params=pltpu.CompilerParams(
                dimension_semantics=("parallel",)),
            cost_estimate=pl.CostEstimate(
                flops=int(flops),
                transcendentals=int(transcendentals),
                bytes_accessed=int(bytes_accessed)),
        )(t_p, w1p, b1p, w2p, b2p, w3p, b3p)

    if single_buffer_weights:
        try:
            out_padded = run(pl.Buffered(1))   # grid-invariant operands: 1 buffer
        except Exception:
            # Installed jax rejects single-buffering; default buffering is fine.
            out_padded = run(None)
    else:
        out_padded = run(None)

    return out_padded[:B, :d_out]


def init_params(key, input_dim, output_dim, hidden_dim=HIDDEN):
    """torch.nn.Linear default init: U(-1/sqrt(fan_in), 1/sqrt(fan_in)); W is [fan_in, fan_out]."""
    ks = jax.random.split(key, 6)

    def linear(kw, kb, fan_in, fan_out):
        bound = 1.0 / jnp.sqrt(fan_in)
        w = jax.random.uniform(kw, (fan_in, fan_out), jnp.float32, -bound, bound)
        b = jax.random.uniform(kb, (fan_out,), jnp.float32, -bound, bound)
        return w, b

    w1, b1 = linear(ks[0], ks[1], input_dim, hidden_dim)
    w2, b2 = linear(ks[2], ks[3], hidden_dim, hidden_dim)
    w3, b3 = linear(ks[4], ks[5], hidden_dim, output_dim)
    return (w1, b1, w2, b2, w3, b3)


def reference_forward(x, t, params):
    """Pure-JAX reference of the PyTorch forward (unpadded, f32)."""
    del x
    w1, b1, w2, b2, w3, b3 = params
    h = _softplus(t @ w1 + b1)
    h = _softplus(h @ w2 + b2)
    return h @ w3 + b3


if __name__ == "__main__":
    key = jax.random.PRNGKey(0)
    k_params, k_t1, k_t2 = jax.random.split(key, 3)

    input_dim = 4
    output_dim = 4
    params = init_params(k_params, input_dim, output_dim)

    # --- check 1: small batch, f32 MXU + f32 softplus path, tight tolerance ---
    padded_f32 = pad_params(params, matmul_dtype=jnp.float32)
    B1 = 8
    x1 = jnp.zeros((B1, input_dim), jnp.float32)   # unused, like PyTorch (x = t)
    t1 = jax.random.normal(k_t1, (B1, input_dim), jnp.float32)
    out1 = jax.block_until_ready(
        neural_ode_forward(x1, t1, padded_f32, out_dtype=jnp.float32))
    ref1 = reference_forward(x1, t1, params)
    assert out1.shape == (B1, output_dim)
    assert jnp.allclose(out1, ref1, atol=1e-5, rtol=1e-5), "f32 mismatch vs reference"

    # --- check 2: larger batch, bf16 MXU (+ bf16 softplus on v6e/v7x),
    #     multi-step grid (params padded once and reused, as in an ODE loop) ---
    padded_bf16 = pad_params(params, matmul_dtype=jnp.bfloat16)
    B2 = 512
    t2 = jax.random.normal(k_t2, (B2, input_dim), jnp.float32)
    out2 = jax.block_until_ready(
        neural_ode_forward(None, t2, padded_bf16, block_b=256))
    ref2 = reference_forward(None, t2, params)
    assert out2.shape == (B2, output_dim)
    assert jnp.allclose(out2.astype(jnp.float32), ref2, atol=1e-1, rtol=1e-1), \
        "bf16 mismatch vs reference"

    print("KERNEL_OK")
</pallas_src>

<mosaic_0001>
module attributes {stable_mosaic.version = 11 : i64} {
  func.func @mlp_kernel(%arg0: i32, %arg1: memref<8x4xf32, #tpu.memory_space<vmem>>, %arg2: memref<4x128xf32, #tpu.memory_space<vmem>>, %arg3: memref<1x128xf32, #tpu.memory_space<vmem>>, %arg4: memref<128x128xf32, #tpu.memory_space<vmem>>, %arg5: memref<1x128xf32, #tpu.memory_space<vmem>>, %arg6: memref<128x128xf32, #tpu.memory_space<vmem>>, %arg7: memref<1x128xf32, #tpu.memory_space<vmem>>, %arg8: memref<8x128xf32, #tpu.memory_space<vmem>>) attributes {dimension_semantics = [#tpu.dimension_semantics<parallel>], iteration_bounds = array<i64: 1>, scalar_prefetch = 0 : i64, scratch_operands = 0 : i64, tpu.core_type = #tpu.core_type<tc>, window_params = [{transform_indices = @transform_0, window_bounds = array<i64: 8, 4>}, {pipeline_mode = #tpu.pipeline_mode<synchronous>, transform_indices = @transform_1, window_bounds = array<i64: 4, 128>}, {pipeline_mode = #tpu.pipeline_mode<synchronous>, transform_indices = @transform_2, window_bounds = array<i64: 1, 128>}, {pipeline_mode = #tpu.pipeline_mode<synchronous>, transform_indices = @transform_3, window_bounds = array<i64: 128, 128>}, {pipeline_mode = #tpu.pipeline_mode<synchronous>, transform_indices = @transform_4, window_bounds = array<i64: 1, 128>}, {pipeline_mode = #tpu.pipeline_mode<synchronous>, transform_indices = @transform_5, window_bounds = array<i64: 128, 128>}, {pipeline_mode = #tpu.pipeline_mode<synchronous>, transform_indices = @transform_6, window_bounds = array<i64: 1, 128>}, {transform_indices = @transform_7, window_bounds = array<i64: 8, 128>}]} {
    %c0 = arith.constant 0 : index
    %c0_0 = arith.constant 0 : index
    %0 = vector.load %arg1[%c0, %c0_0] : memref<8x4xf32, #tpu.memory_space<vmem>>, vector<8x4xf32>
    %c0_1 = arith.constant 0 : index
    %c0_2 = arith.constant 0 : index
    %1 = vector.load %arg2[%c0_1, %c0_2] : memref<4x128xf32, #tpu.memory_space<vmem>>, vector<4x128xf32>
    %cst = arith.constant dense<0.000000e+00> : vector<8x128xf32>
    %2 = tpu.matmul %0, %1, %cst {dimension_numbers = #tpu.dot_dimension_numbers<[1], [0], [0], [1], [0, 0, 1, 1], [], []>} : vector<8x4xf32>, vector<4x128xf32>, vector<8x128xf32> -> vector<8x128xf32>
    %c0_3 = arith.constant 0 : index
    %c0_4 = arith.constant 0 : index
    %3 = vector.load %arg3[%c0_3, %c0_4] : memref<1x128xf32, #tpu.memory_space<vmem>>, vector<1x128xf32>
    %4 = vector.broadcast %3 : vector<1x128xf32> to vector<8x128xf32>
    %5 = arith.addf %2, %4 : vector<8x128xf32>
    %cst_5 = arith.constant 2.000000e+01 : f32
    %6 = vector.broadcast %cst_5 : f32 to vector<8x128xf32>
    %7 = arith.cmpf ogt, %5, %6 : vector<8x128xf32>
    %8 = math.exp %5 : vector<8x128xf32>
    %9 = math.log1p %8 : vector<8x128xf32>
    %10 = arith.select %7, %5, %9 : vector<8x128xi1>, vector<8x128xf32>
    %c0_6 = arith.constant 0 : index
    %c0_7 = arith.constant 0 : index
    %11 = vector.load %arg4[%c0_6, %c0_7] : memref<128x128xf32, #tpu.memory_space<vmem>>, vector<128x128xf32>
    %cst_8 = arith.constant dense<0.000000e+00> : vector<8x128xf32>
    %12 = tpu.matmul %10, %11, %cst_8 {dimension_numbers = #tpu.dot_dimension_numbers<[1], [0], [0], [1], [0, 0, 1, 1], [], []>} : vector<8x128xf32>, vector<128x128xf32>, vector<8x128xf32> -> vector<8x128xf32>
    %c0_9 = arith.constant 0 : index
    %c0_10 = arith.constant 0 : index
    %13 = vector.load %arg5[%c0_9, %c0_10] : memref<1x128xf32, #tpu.memory_space<vmem>>, vector<1x128xf32>
    %14 = vector.broadcast %13 : vector<1x128xf32> to vector<8x128xf32>
    %15 = arith.addf %12, %14 : vector<8x128xf32>
    %cst_11 = arith.constant 2.000000e+01 : f32
    %16 = vector.broadcast %cst_11 : f32 to vector<8x128xf32>
    %17 = arith.cmpf ogt, %15, %16 : vector<8x128xf32>
    %18 = math.exp %15 : vector<8x128xf32>
    %19 = math.log1p %18 : vector<8x128xf32>
    %20 = arith.select %17, %15, %19 : vector<8x128xi1>, vector<8x128xf32>
    %c0_12 = arith.constant 0 : index
    %c0_13 = arith.constant 0 : index
    %21 = vector.load %arg6[%c0_12, %c0_13] : memref<128x128xf32, #tpu.memory_space<vmem>>, vector<128x128xf32>
    %cst_14 = arith.constant dense<0.000000e+00> : vector<8x128xf32>
    %22 = tpu.matmul %20, %21, %cst_14 {dimension_numbers = #tpu.dot_dimension_numbers<[1], [0], [0], [1], [0, 0, 1, 1], [], []>} : vector<8x128xf32>, vector<128x128xf32>, vector<8x128xf32> -> vector<8x128xf32>
    %c0_15 = arith.constant 0 : index
    %c0_16 = arith.constant 0 : index
    %23 = vector.load %arg7[%c0_15, %c0_16] : memref<1x128xf32, #tpu.memory_space<vmem>>, vector<1x128xf32>
    %24 = vector.broadcast %23 : vector<1x128xf32> to vector<8x128xf32>
    %25 = arith.addf %22, %24 : vector<8x128xf32>
    %c0_17 = arith.constant 0 : index
    %c0_18 = arith.constant 0 : index
    %26 = vector.load %arg8[%c0_17, %c0_18] : memref<8x128xf32, #tpu.memory_space<vmem>>, vector<8x128xf32>
    tpu.vector_store %arg8[%c0_17, %c0_18], %25 {strides = array<i32>} : memref<8x128xf32, #tpu.memory_space<vmem>>, vector<8x128xf32>,
    return
  }
  func.func @transform_0(%arg0: i32) -> (i32, i32) {
    %c0_i32 = arith.constant 0 : i32
    %c0_i32_0 = arith.constant 0 : i32
    return %arg0, %c0_i32 : i32, i32
  }
  func.func @transform_1(%arg0: i32) -> (i32, i32) {
    %c0_i32 = arith.constant 0 : i32
    %c0_i32_0 = arith.constant 0 : i32
    %c0_i32_1 = arith.constant 0 : i32
    return %c0_i32, %c0_i32_0 : i32, i32
  }
  func.func @transform_2(%arg0: i32) -> (i32, i32) {
    %c0_i32 = arith.constant 0 : i32
    %c0_i32_0 = arith.constant 0 : i32
    %c0_i32_1 = arith.constant 0 : i32
    return %c0_i32, %c0_i32_0 : i32, i32
  }
  func.func @transform_3(%arg0: i32) -> (i32, i32) {
    %c0_i32 = arith.constant 0 : i32
    %c0_i32_0 = arith.constant 0 : i32
    %c0_i32_1 = arith.constant 0 : i32
    return %c0_i32, %c0_i32_0 : i32, i32
  }
  func.func @transform_4(%arg0: i32) -> (i32, i32) {
    %c0_i32 = arith.constant 0 : i32
    %c0_i32_0 = arith.constant 0 : i32
    %c0_i32_1 = arith.constant 0 : i32
    return %c0_i32, %c0_i32_0 : i32, i32
  }
  func.func @transform_5(%arg0: i32) -> (i32, i32) {
    %c0_i32 = arith.constant 0 : i32
    %c0_i32_0 = arith.constant 0 : i32
    %c0_i32_1 = arith.constant 0 : i32
    return %c0_i32, %c0_i32_0 : i32, i32
  }
  func.func @transform_6(%arg0: i32) -> (i32, i32) {
    %c0_i32 = arith.constant 0 : i32
    %c0_i32_0 = arith.constant 0 : i32
    %c0_i32_1 = arith.constant 0 : i32
    return %c0_i32, %c0_i32_0 : i32, i32
  }
  func.func @transform_7(%arg0: i32) -> (i32, i32) {
    %c0_i32 = arith.constant 0 : i32
    %c0_i32_0 = arith.constant 0 : i32
    return %arg0, %c0_i32 : i32, i32
  }
}

module attributes {stable_mosaic.version = 11 : i64} {
  func.func @mlp_kernel(%arg0: i32, %arg1: memref<8x4xf32, #tpu.memory_space<vmem>>, %arg2: memref<4x128xf32, #tpu.memory_space<vmem>>, %arg3: memref<1x128xf32, #tpu.memory_space<vmem>>, %arg4: memref<128x128xf32, #tpu.memory_space<vmem>>, %arg5: memref<1x128xf32, #tpu.memory_space<vmem>>, %arg6: memref<128x128xf32, #tpu.memory_space<vmem>>, %arg7: memref<1x128xf32, #tpu.memory_space<vmem>>, %arg8: memref<8x128xf32, #tpu.memory_space<vmem>>) attributes {dimension_semantics = [#tpu.dimension_semantics<parallel>], iteration_bounds = array<i64: 1>, scalar_prefetch = 0 : i64, scratch_operands = 0 : i64, tpu.core_type = #tpu.core_type<tc>, window_params = [{transform_indices = @transform_0, window_bounds = array<i64: 8, 4>}, {pipeline_mode = #tpu.pipeline_mode<synchronous>, transform_indices = @transform_1, window_bounds = array<i64: 4, 128>}, {pipeline_mode = #tpu.pipeline_mode<synchronous>, transform_indices = @transform_2, window_bounds = array<i64: 1, 128>}, {pipeline_mode = #tpu.pipeline_mode<synchronous>, transform_indices = @transform_3, window_bounds = array<i64: 128, 128>}, {pipeline_mode = #tpu.pipeline_mode<synchronous>, transform_indices = @transform_4, window_bounds = array<i64: 1, 128>}, {pipeline_mode = #tpu.pipeline_mode<synchronous>, transform_indices = @transform_5, window_bounds = array<i64: 128, 128>}, {pipeline_mode = #tpu.pipeline_mode<synchronous>, transform_indices = @transform_6, window_bounds = array<i64: 1, 128>}, {transform_indices = @transform_7, window_bounds = array<i64: 8, 128>}]} {
    %c0 = arith.constant 0 : index
    %c0_0 = arith.constant 0 : index
    %0 = vector.load %arg1[%c0, %c0_0] : memref<8x4xf32, #tpu.memory_space<vmem>>, vector<8x4xf32>
    %c0_1 = arith.constant 0 : index
    %c0_2 = arith.constant 0 : index
    %1 = vector.load %arg2[%c0_1, %c0_2] : memref<4x128xf32, #tpu.memory_space<vmem>>, vector<4x128xf32>
    %cst = arith.constant dense<0.000000e+00> : vector<8x128xf32>
    %2 = tpu.matmul %0, %1, %cst {dimension_numbers = #tpu.dot_dimension_numbers<[1], [0], [0], [1], [0, 0, 1, 1], [], []>} : vector<8x4xf32>, vector<4x128xf32>, vector<8x128xf32> -> vector<8x128xf32>
    %c0_3 = arith.constant 0 : index
    %c0_4 = arith.constant 0 : index
    %3 = vector.load %arg3[%c0_3, %c0_4] : memref<1x128xf32, #tpu.memory_space<vmem>>, vector<1x128xf32>
    %4 = vector.broadcast %3 : vector<1x128xf32> to vector<8x128xf32>
    %5 = arith.addf %2, %4 : vector<8x128xf32>
    %cst_5 = arith.constant 2.000000e+01 : f32
    %6 = vector.broadcast %cst_5 : f32 to vector<8x128xf32>
    %7 = arith.cmpf ogt, %5, %6 : vector<8x128xf32>
    %8 = math.exp %5 : vector<8x128xf32>
    %9 = math.log1p %8 : vector<8x128xf32>
    %10 = arith.select %7, %5, %9 : vector<8x128xi1>, vector<8x128xf32>
    %c0_6 = arith.constant 0 : index
    %c0_7 = arith.constant 0 : index
    %11 = vector.load %arg4[%c0_6, %c0_7] : memref<128x128xf32, #tpu.memory_space<vmem>>, vector<128x128xf32>
    %cst_8 = arith.constant dense<0.000000e+00> : vector<8x128xf32>
    %12 = tpu.matmul %10, %11, %cst_8 {dimension_numbers = #tpu.dot_dimension_numbers<[1], [0], [0], [1], [0, 0, 1, 1], [], []>} : vector<8x128xf32>, vector<128x128xf32>, vector<8x128xf32> -> vector<8x128xf32>
    %c0_9 = arith.constant 0 : index
    %c0_10 = arith.constant 0 : index
    %13 = vector.load %arg5[%c0_9, %c0_10] : memref<1x128xf32, #tpu.memory_space<vmem>>, vector<1x128xf32>
    %14 = vector.broadcast %13 : vector<1x128xf32> to vector<8x128xf32>
    %15 = arith.addf %12, %14 : vector<8x128xf32>
    %cst_11 = arith.constant 2.000000e+01 : f32
    %16 = vector.broadcast %cst_11 : f32 to vector<8x128xf32>
    %17 = arith.cmpf ogt, %15, %16 : vector<8x128xf32>
    %18 = math.exp %15 : vector<8x128xf32>
    %19 = math.log1p %18 : vector<8x128xf32>
    %20 = arith.select %17, %15, %19 : vector<8x128xi1>, vector<8x128xf32>
    %c0_12 = arith.constant 0 : index
    %c0_13 = arith.constant 0 : index
    %21 = vector.load %arg6[%c0_12, %c0_13] : memref<128x128xf32, #tpu.memory_space<vmem>>, vector<128x128xf32>
    %cst_14 = arith.constant dense<0.000000e+00> : vector<8x128xf32>
    %22 = tpu.matmul %20, %21, %cst_14 {dimension_numbers = #tpu.dot_dimension_numbers<[1], [0], [0], [1], [0, 0, 1, 1], [], []>} : vector<8x128xf32>, vector<128x128xf32>, vector<8x128xf32> -> vector<8x128xf32>
    %c0_15 = arith.constant 0 : index
    %c0_16 = arith.constant 0 : index
    %23 = vector.load %arg7[%c0_15, %c0_16] : memref<1x128xf32, #tpu.memory_space<vmem>>, vector<1x128xf32>
    %24 = vector.broadcast %23 : vector<1x128xf32> to vector<8x128xf32>
    %25 = arith.addf %22, %24 : vector<8x128xf32>
    %c0_17 = arith.constant 0 : index
    %c0_18 = arith.constant 0 : index
    %26 = vector.load %arg8[%c0_17, %c0_18] : memref<8x128xf32, #tpu.memory_space<vmem>>, vector<8x128xf32>
    tpu.vector_store %arg8[%c0_17, %c0_18], %25 {strides = array<i32>} : memref<8x128xf32, #tpu.memory_space<vmem>>, vector<8x128xf32>,
    return
  }
  func.func @transform_0(%arg0: i32) -> (i32, i32) {
    %c0_i32 = arith.constant 0 : i32
    %c0_i32_0 = arith.constant 0 : i32
    return %arg0, %c0_i32 : i32, i32
  }
  func.func @transform_1(%arg0: i32) -> (i32, i32) {
    %c0_i32 = arith.constant 0 : i32
    %c0_i32_0 = arith.constant 0 : i32
    %c0_i32_1 = arith.constant 0 : i32
    return %c0_i32, %c0_i32_0 : i32, i32
  }
  func.func @transform_2(%arg0: i32) -> (i32, i32) {
    %c0_i32 = arith.constant 0 : i32
    %c0_i32_0 = arith.constant 0 : i32
    %c0_i32_1 = arith.constant 0 : i32
    return %c0_i32, %c0_i32_0 : i32, i32
  }
  func.func @transform_3(%arg0: i32) -> (i32, i32) {
    %c0_i32 = arith.constant 0 : i32
    %c0_i32_0 = arith.constant 0 : i32
    %c0_i32_1 = arith.constant 0 : i32
    return %c0_i32, %c0_i32_0 : i32, i32
  }
  func.func @transform_4(%arg0: i32) -> (i32, i32) {
    %c0_i32 = arith.constant 0 : i32
    %c0_i32_0 = arith.constant 0 : i32
    %c0_i32_1 = arith.constant 0 : i32
    return %c0_i32, %c0_i32_0 : i32, i32
  }
  func.func @transform_5(%arg0: i32) -> (i32, i32) {
    %c0_i32 = arith.constant 0 : i32
    %c0_i32_0 = arith.constant 0 : i32
    %c0_i32_1 = arith.constant 0 : i32
    return %c0_i32, %c0_i32_0 : i32, i32
  }
  func.func @transform_6(%arg0: i32) -> (i32, i32) {
    %c0_i32 = arith.constant 0 : i32
    %c0_i32_0 = arith.constant 0 : i32
    %c0_i32_1 = arith.constant 0 : i32
    return %c0_i32, %c0_i32_0 : i32, i32
  }
  func.func @transform_7(%arg0: i32) -> (i32, i32) {
    %c0_i32 = arith.constant 0 : i32
    %c0_i32_0 = arith.constant 0 : i32
    return %arg0, %c0_i32 : i32, i32
  }
}

</mosaic_0001>

<bundles_post_ra>
// kernel: tpu_custom_call.1
= control target key start
LH: loop header
LB: loop body
LE: loop exit
PB: predicated region body
PF: predicated region fallthrough
CT: control target
= control target key end

     0   :  { %12 = vsyncpa [#allocation3], 0  ;;  %s738_s0 = inlined_call_operand.vmem [shape: f32[8,4], index: 0, kind: input, shape index: {}]   ;;  %s739_s1 = inlined_call_operand.vmem [shape: f32[4,128], index: 1, kind: input, shape index: {}]   ;;  %s740_s2 = inlined_call_operand.vmem [shape: f32[1,128], index: 2, kind: input, shape index: {}]   ;;  %s741_s3 = inlined_call_operand.hbm [shape: f32[128,128], index: 3, kind: input, shape index: {}]   ;;  %s742_s4 = inlined_call_operand.vmem [shape: f32[1,128], index: 4, kind: input, shape index: {}]   ;;  %s743_s5 = inlined_call_operand.hbm [shape: f32[128,128], index: 5, kind: input, shape index: {}]   ;;  %s744_s6 = inlined_call_operand.vmem [shape: f32[1,128], index: 6, kind: input, shape index: {}]   ;;  %s745_s7 = inlined_call_operand.hbm [shape: f32[8,128], index: 7, kind: output, shape index: {}]  }
   0x1   :  { %13 = vsyncpa [#allocation6], 0 }
   0x2   :  { %14 = vsyncpa [#allocation4], 0  ;;  %s623_s24 = smov [#allocation2]   ;;  %s551_s28 = scalar_lea.hbm %s741_s3, 2048 }
   0x3   :  { %s26_s25 = sshll.u32 %s623_s24, 4  ;;  %p552_p0 = scmp.ne.s32.totalorder %s741_s3, %s551_s28  ;;  %s27_s25 = int_to_ptr.vmem [resolvable:$true] %s26_s25 }
   0x4   :  { %p555_p1 = scmp.lt.u32.totalorder %s551_s28, %s741_s3 }
   0x6   :  { %p557_p2 = pnand %p555_p1, %p552_p0 }
   0x8   :  { %560 = shalt.err (!%p557_p2)
}
   0x9   :  { %s561_s10 = scalar_lea.vmem %s27_s25, 2048  ;;  %p566_p4 = scmp.lt.s32.totalorder %s27_s25, %s27_s25 }
   0xa   :  { %p562_p3 = scmp.ne.s32.totalorder %s27_s25, %s561_s10  ;;  %p567_p5 = scmp.lt.s32.totalorder %s561_s10, %s561_s10 }
   0xc   :  { %p568_p6 = por %p567_p5, %p566_p4 }
   0xe   :  { %p569_p7 = pnand %p568_p6, %p562_p3 }
  0x10   :  { %572 = shalt.err (!%p569_p7)
}
  0x11   :  { %s624_s11 = smov 128   ;;  %s625_s12 = smov 8  }
  0x12   :  { %32 = dma.hbm_to_vmem [thread:$0]  %s741_s3, 2048, %s27_s25, [#allocation3], %s624_s11, %s624_s11, %s625_s12  }
  0x13   :  { %s626_s15 = smov [#allocation5]   ;;  %s573_s19 = scalar_lea.hbm %s743_s5, 2048 }
  0x14   :  { %s40_s16 = sshll.u32 %s626_s15, 4  ;;  %p574_p8 = scmp.ne.s32.totalorder %s743_s5, %s573_s19  ;;  %s41_s16 = int_to_ptr.vmem [resolvable:$true] %s40_s16 }
  0x15   :  { %p577_p9 = scmp.lt.u32.totalorder %s573_s19, %s743_s5 }
  0x17   :  { %p579_p10 = pnand %p577_p9, %p574_p8 }
  0x19   :  { %582 = shalt.err (!%p579_p10)
}
  0x1a   :  { %s583_s24 = scalar_lea.vmem %s41_s16, 2048  ;;  %p588_p12 = scmp.lt.s32.totalorder %s41_s16, %s41_s16 }
  0x1b   :  { %p584_p11 = scmp.ne.s32.totalorder %s41_s16, %s583_s24  ;;  %p589_p13 = scmp.lt.s32.totalorder %s583_s24, %s583_s24 }
  0x1d   :  { %p590_p0 = por %p589_p13, %p588_p12 }
  0x1f   :  { %p591_p1 = pnand %p590_p0, %p584_p11 }
  0x21   :  { %594 = shalt.err (!%p591_p1)
}
  0x22   :  { %46 = dma.hbm_to_vmem [thread:$0]  %s743_s5, 2048, %s41_s16, [#allocation6], %s624_s11, %s624_s11, %s625_s12  }
  0x23   :  { %617 = dma.done.wait [#allocation3], 2048  }
  0x24   :  { %618 = vsyncadd [#allocation3], 4294965248 }
  0x25   :  { %619 = dma.done.wait [#allocation6], 2048  }
  0x26   :  { %620 = vsyncadd [#allocation6], 4294965248  ;;  %v627_v0 = vmov 0.0   ;;  %vm628_vm0 = vmmov 0   ;;  %vm68_vm1 = vcmask 1043456   ;;  %vm64_vm2 = vcmask 31744  }
  0x27   :  { %412 = vmatprep.subr.mxu0 %v627_v0  ;;  %414 = vmatprep.mubr.msk.f32.mxu0 %vm628_vm0, %v627_v0  ;;  %v56_v1 = vld [vmem:[%s739_s1] sm:$0xf]  ;;  %v156_v4 = vld [vmem:[#allocation2 + $0x8] sm:$0xff]  ;;  %v629_v6 = vmov 0.0|0.0   ;;  %v157_v7 = vld [vmem:[#allocation2 + $0x10] sm:$0xff]  ;;  %s630_s8 = smov [#allocation7]  }
  0x28   :  { %449 = vmatprep.mubr.msk.f32.mxu1 %vm628_vm0, %v627_v0  ;;  %v55_v2 = vld [vmem:[%s738_s0] sm:$0xff]  ;;  %413 = vmatpush3.msk.msra.mxu0 %vm68_vm1, %v56_v1  ;;  %v158_v8 = vld [vmem:[#allocation2 + $0x18] sm:$0xff]  ;;  %v160_v11 = vld [vmem:[#allocation2 + $0x28] sm:$0xff]  ;;  %s361_s9 = sshll.u32 %s630_s8, 4  ;;  %s362_s9 = int_to_ptr.vmem [resolvable:$true] %s361_s9 }
  0x29   :  { %415 = vmatmul.mubr.msk.f32.vlgmr.msra.gmra.mrb[0].mxu0 %vm64_vm2, %v55_v2  ;;  %v155_v3 = vld [vmem:[#allocation2] sm:$0xff]  ;;  %487 = vmatprep.subr.bf16.mxu1 %v629_v6  ;;  %v491_v9 = vpack.c.bf16 %v158_v8, %v157_v7  ;;  %v161_v13 = vld [vmem:[#allocation2 + $0x30] sm:$0xff]  ;;  %v162_v14 = vld [vmem:[#allocation2 + $0x38] sm:$0xff]  ;;  %s595_s10 = scalar_lea.vmem %s362_s9, 128  ;;  %p600_p3 = scmp.lt.s32.totalorder %s362_s9, %s362_s9 }
  0x2a   :  { %484 = vmatprep.mubr.msk.f32.mxu0 %vm628_vm0, %v627_v0  ;;  %v488_v5 = vpack.c.bf16 %v156_v4, %v155_v3  ;;  %511 = vmatprep.subr.bf16.mxu0 %v629_v6  ;;  %v159_v10 = vld [vmem:[#allocation2 + $0x20] sm:$0xff]  ;;  %v497_v15 = vpack.c.bf16 %v162_v14, %v161_v13  ;;  %v164_v17 = vld [vmem:[#allocation2 + $0x48] sm:$0xff]  ;;  %v165_v19 = vld [vmem:[#allocation2 + $0x50] sm:$0xff]  ;;  %p596_p2 = scmp.ne.s32.totalorder %s362_s9, %s595_s10  ;;  %p601_p4 = scmp.lt.s32.totalorder %s595_s10, %s595_s10 }
  0x2b   :  { %v494_v12 = vpack.c.bf16 %v160_v11, %v159_v10  ;;  %v163_v16 = vld [vmem:[#allocation2 + $0x40] sm:$0xff]  ;;  %v166_v20 = vld [vmem:[#allocation2 + $0x58] sm:$0xff]  ;;  %v168_v23 = vld [vmem:[#allocation2 + $0x68] sm:$0xff] }
  0x2c   :  { %489 = vmatpush3.bf16.msra.mxu1 %v488_v5  ;;  %v500_v18 = vpack.c.bf16 %v164_v17, %v163_v16  ;;  %v503_v21 = vpack.c.bf16 %v166_v20, %v165_v19  ;;  %v167_v22 = vld [vmem:[#allocation2 + $0x60] sm:$0xff]  ;;  %v169_v25 = vld [vmem:[#allocation2 + $0x70] sm:$0xff]  ;;  %v170_v26 = vld [vmem:[#allocation2 + $0x78] sm:$0xff]  ;;  %p602_p5 = por %p601_p4, %p600_p3 }
  0x2d   :  { %490 = vmatprep.subr.bf16.mxu1 %v629_v6  ;;  %v506_v24 = vpack.c.bf16 %v168_v23, %v167_v22  ;;  %v509_v27 = vpack.c.bf16 %v170_v26, %v169_v25  ;;  %v371_v28 = vld [vmem:[%s740_s2] ss:$0 sm:$0xff]  ;;  %v262_v44 = vld [vmem:[#allocation5 + $0x8] sm:$0xff]  ;;  %v263_v46 = vld [vmem:[#allocation5 + $0x10] sm:$0xff] }
  0x2e   :  { %v261_v43 = vld [vmem:[#allocation5] sm:$0xff]  ;;  %v264_v47 = vld [vmem:[#allocation5 + $0x18] sm:$0xff]  ;;  %v266_v50 = vld [vmem:[#allocation5 + $0x28] sm:$0xff]  ;;  %p603_p6 = pnand %p602_p5, %p596_p2 }
  0x2f   :  { %v512_v45 = vpack.c.bf16 %v262_v44, %v261_v43  ;;  %v515_v48 = vpack.c.bf16 %v264_v47, %v263_v46  ;;  %v265_v49 = vld [vmem:[#allocation5 + $0x20] sm:$0xff]  ;;  %v267_v52 = vld [vmem:[#allocation5 + $0x30] sm:$0xff]  ;;  %v268_v53 = vld [vmem:[#allocation5 + $0x38] sm:$0xff] }
  0x30   :  { %492 = vmatpush3.bf16.msra.mxu1 %v491_v9  ;;  %v518_v51 = vpack.c.bf16 %v266_v50, %v265_v49  ;;  %v521_v54 = vpack.c.bf16 %v268_v53, %v267_v52  ;;  %v269_v55 = vld [vmem:[#allocation5 + $0x40] sm:$0xff]  ;;  %v270_v56 = vld [vmem:[#allocation5 + $0x48] sm:$0xff]  ;;  %v271_v58 = vld [vmem:[#allocation5 + $0x50] sm:$0xff] }
  0x31   :  { %493 = vmatprep.subr.bf16.mxu1 %v629_v6  ;;  %513 = vmatpush3.bf16.msra.mxu0 %v512_v45  ;;  %v524_v57 = vpack.c.bf16 %v270_v56, %v269_v55  ;;  %v272_v59 = vld [vmem:[#allocation5 + $0x58] sm:$0xff]  ;;  %v273_v61 = vld [vmem:[#allocation5 + $0x60] sm:$0xff]  ;;  %v274_v62 = vld [vmem:[#allocation5 + $0x68] sm:$0xff] }
  0x32   :  { %514 = vmatprep.subr.bf16.mxu0 %v629_v6  ;;  %v527_v60 = vpack.c.bf16 %v272_v59, %v271_v58  ;;  %v530_v63 = vpack.c.bf16 %v274_v62, %v273_v61  ;;  %v275_v0 = vld [vmem:[#allocation5 + $0x70] sm:$0xff]  ;;  %v276_v1 = vld [vmem:[#allocation5 + $0x78] sm:$0xff]  ;;  %v374_v3 = vld [vmem:[%s742_s4] ss:$0 sm:$0xff] }
  0x33   :  { %v533_v2 = vpack.c.bf16 %v276_v1, %v275_v0 }
  0x34   :  { %495 = vmatpush3.bf16.msra.mxu1 %v494_v12 }
  0x35   :  { %496 = vmatprep.subr.bf16.mxu1 %v629_v6  ;;  %516 = vmatpush3.bf16.msra.mxu0 %v515_v48 }
  0x36   :  { %517 = vmatprep.subr.bf16.mxu0 %v629_v6 }
  0x38   :  { %498 = vmatpush3.bf16.msra.mxu1 %v497_v15 }
  0x39   :  { %499 = vmatprep.subr.bf16.mxu1 %v629_v6  ;;  %519 = vmatpush3.bf16.msra.mxu0 %v518_v51 }
  0x3a   :  { %520 = vmatprep.subr.bf16.mxu0 %v629_v6 }
  0x3c   :  { %501 = vmatpush3.bf16.msra.mxu1 %v500_v18  ;;  %v375_v18 = vld [vmem:[%s744_s6] ss:$0 sm:$0xff] }
  0x3d   :  { %502 = vmatprep.subr.bf16.mxu1 %v629_v6  ;;  %522 = vmatpush3.bf16.msra.mxu0 %v521_v54 }
  0x3e   :  { %523 = vmatprep.subr.bf16.mxu0 %v629_v6 }
  0x40   :  { %504 = vmatpush3.bf16.msra.mxu1 %v503_v21 }
  0x41   :  { %505 = vmatprep.subr.bf16.mxu1 %v629_v6  ;;  %525 = vmatpush3.bf16.msra.mxu0 %v524_v57 }
  0x42   :  { %526 = vmatprep.subr.bf16.mxu0 %v629_v6 }
  0x44   :  { %507 = vmatpush3.bf16.msra.mxu1 %v506_v24 }
  0x45   :  { %508 = vmatprep.subr.bf16.mxu1 %v629_v6  ;;  %528 = vmatpush3.bf16.msra.mxu0 %v527_v60 }
  0x46   :  { %529 = vmatprep.subr.bf16.mxu0 %v629_v6 }
  0x48   :  { %510 = vmatpush3.bf16.msra.mxu1 %v509_v27 }
  0x49   :  { %531 = vmatpush3.bf16.msra.mxu0 %v530_v63 }
  0x4a   :  { %532 = vmatprep.subr.bf16.mxu0 %v629_v6 }
  0x4d   :  { %534 = vmatpush3.bf16.msra.mxu0 %v533_v2 }
  0xfc   :  { %v138_v29 = vpop.f32.mrb[0].mxu0 }
  0xfd   :  { %v139_v30 = vadd.f32 %v371_v28, %v138_v29  ;;  %v416_v31 = vpop.f32.mrb[1].mxu0 }
  0xff   :  { %v143_v32 = vmul.f32 1.442695, %v139_v30  ;;  %vm142_vm4 = vcmp.gt.f32.partialorder %v139_v30, 20.0 }
 0x101   :  { %543 = vpow2.f32 %v143_v32 }
 0x10b   :  { %v544_v33 = vpop.eup %543 }
 0x10c   :  { %v145_v34 = vadd.f32 1.0, %v544_v33  ;;  %v148_v35 = vmul.f32 -0.5, %v544_v33  ;;  %v151_v37 = vand.u32 2147483647, %v544_v33 }
 0x10e   :  { %545 = vlog2.f32 %v145_v34  ;;  %v149_v36 = vadd.f32 1.0, %v148_v35  ;;  %vm152_vm3 = vcmp.lt.f32.partialorder %v151_v37, 0.0004427343 }
 0x110   :  { %v150_v40 = vmul.f32 %v544_v33, %v149_v36 }
 0x118   :  { %v546_v38 = vpop.eup %545 }
 0x119   :  { %v147_v39 = vmul.f32 0.6931472, %v546_v38 }
 0x11b   :  { %v153_v41 = vsel %vm152_vm3, %v150_v40, %v147_v39 }
 0x11c   :  { %v154_v42 = vsel %vm142_vm4, %v139_v30, %v153_v41 }
 0x11d   :  { %450 = vmatmul.mubr.f32.vlgmr.msra.gmra.mrb[0].mxu1 %v154_v42 }
 0x1f0   :  { %v244_v4 = vpop.f32.mrb[0].mxu1 }
 0x1f1   :  { %v245_v5 = vadd.f32 %v374_v3, %v244_v4  ;;  %v451_v7 = vpop.f32.mrb[1].mxu1 }
 0x1f3   :  { %v249_v8 = vmul.f32 1.442695, %v245_v5  ;;  %vm248_vm6 = vcmp.gt.f32.partialorder %v245_v5, 20.0 }
 0x1f5   :  { %547 = vpow2.f32 %v249_v8 }
 0x1ff   :  { %v548_v9 = vpop.eup %547 }
 0x200   :  { %v251_v10 = vadd.f32 1.0, %v548_v9  ;;  %v254_v11 = vmul.f32 -0.5, %v548_v9  ;;  %v257_v13 = vand.u32 2147483647, %v548_v9 }
 0x202   :  { %549 = vlog2.f32 %v251_v10  ;;  %v255_v12 = vadd.f32 1.0, %v254_v11  ;;  %vm258_vm5 = vcmp.lt.f32.partialorder %v257_v13, 0.0004427343 }
 0x204   :  { %v256_v16 = vmul.f32 %v548_v9, %v255_v12 }
 0x20c   :  { %v550_v14 = vpop.eup %549 }
 0x20d   :  { %v253_v15 = vmul.f32 0.6931472, %v550_v14 }
 0x20f   :  { %v259_v6 = vsel %vm258_vm5, %v256_v16, %v253_v15 }
 0x210   :  { %v260_v17 = vsel %vm248_vm6, %v245_v5, %v259_v6 }
 0x211   :  { %485 = vmatmul.mubr.f32.vlgmr.msra.gmra.mrb[2].mxu0 %v260_v17 }
 0x2e4   :  { %v350_v19 = vpop.f32.mrb[2].mxu0 }
 0x2e5   :  { %v351_v20 = vadd.f32 %v375_v18, %v350_v19  ;;  %v486_v21 = vpop.f32.mrb[3].mxu0 }
 0x2e7   :  { %354 = vst [vmem:[#allocation7] sm:$0xff] %v351_v20 }
 0x2e8   :  { %606 = shalt.err (!%p603_p6)
}
 0x2e9   :  { %s607_s13 = scalar_lea.hbm %s745_s7, 128 }
 0x2ea   :  { %p608_p7 = scmp.ne.s32.totalorder %s745_s7, %s607_s13  ;;  %p611_p8 = scmp.lt.u32.totalorder %s607_s13, %s745_s7 }
 0x2ec   :  { %p613_p9 = pnand %p611_p8, %p608_p7 }
 0x2ee   :  { %616 = shalt.err (!%p613_p9)
}
 0x2ef   :  { %364 = dma.vmem_to_hbm [thread:$0]  %s362_s9, 128, %s745_s7, [#allocation4]  }
 0x2f0   :  { %621 = dma.done.wait [#allocation4], 128  }
 0x2f1   :  { %622 = vsyncadd [#allocation4], 4294967168 }
 0x2f2   :  { %368 = vsyncpa [#allocation3], 1 }
 0x2f3   :  { %369 = vsyncpa [#allocation6], 1 }
 0x2f4   :  { %370 = vsyncpa [#allocation4], 1 }

// kernel: tpu_custom_call.1
= control target key start
LH: loop header
LB: loop body
LE: loop exit
PB: predicated region body
PF: predicated region fallthrough
CT: control target
= control target key end

     0   :  { %12 = vsyncpa [#allocation3], 0  ;;  %s738_s0 = inlined_call_operand.vmem [shape: f32[8,4], index: 0, kind: input, shape index: {}]   ;;  %s739_s1 = inlined_call_operand.vmem [shape: f32[4,128], index: 1, kind: input, shape index: {}]   ;;  %s740_s2 = inlined_call_operand.vmem [shape: f32[1,128], index: 2, kind: input, shape index: {}]   ;;  %s741_s3 = inlined_call_operand.hbm [shape: f32[128,128], index: 3, kind: input, shape index: {}]   ;;  %s742_s4 = inlined_call_operand.vmem [shape: f32[1,128], index: 4, kind: input, shape index: {}]   ;;  %s743_s5 = inlined_call_operand.hbm [shape: f32[128,128], index: 5, kind: input, shape index: {}]   ;;  %s744_s6 = inlined_call_operand.vmem [shape: f32[1,128], index: 6, kind: input, shape index: {}]   ;;  %s745_s7 = inlined_call_operand.hbm [shape: f32[8,128], index: 7, kind: output, shape index: {}]  }
   0x1   :  { %13 = vsyncpa [#allocation6], 0 }
   0x2   :  { %14 = vsyncpa [#allocation4], 0  ;;  %s623_s24 = smov [#allocation2]   ;;  %s551_s28 = scalar_lea.hbm %s741_s3, 2048 }
   0x3   :  { %s26_s25 = sshll.u32 %s623_s24, 4  ;;  %p552_p0 = scmp.ne.s32.totalorder %s741_s3, %s551_s28  ;;  %s27_s25 = int_to_ptr.vmem [resolvable:$true] %s26_s25 }
   0x4   :  { %p555_p1 = scmp.lt.u32.totalorder %s551_s28, %s741_s3 }
   0x6   :  { %p557_p2 = pnand %p555_p1, %p552_p0 }
   0x8   :  { %560 = shalt.err (!%p557_p2)
}
   0x9   :  { %s561_s10 = scalar_lea.vmem %s27_s25, 2048  ;;  %p566_p4 = scmp.lt.s32.totalorder %s27_s25, %s27_s25 }
   0xa   :  { %p562_p3 = scmp.ne.s32.totalorder %s27_s25, %s561_s10  ;;  %p567_p5 = scmp.lt.s32.totalorder %s561_s10, %s561_s10 }
   0xc   :  { %p568_p6 = por %p567_p5, %p566_p4 }
   0xe   :  { %p569_p7 = pnand %p568_p6, %p562_p3 }
  0x10   :  { %572 = shalt.err (!%p569_p7)
}
  0x11   :  { %s624_s11 = smov 128   ;;  %s625_s12 = smov 8  }
  0x12   :  { %32 = dma.hbm_to_vmem [thread:$0]  %s741_s3, 2048, %s27_s25, [#allocation3], %s624_s11, %s624_s11, %s625_s12  }
  0x13   :  { %s626_s15 = smov [#allocation5]   ;;  %s573_s19 = scalar_lea.hbm %s743_s5, 2048 }
  0x14   :  { %s40_s16 = sshll.u32 %s626_s15, 4  ;;  %p574_p8 = scmp.ne.s32.totalorder %s743_s5, %s573_s19  ;;  %s41_s16 = int_to_ptr.vmem [resolvable:$true] %s40_s16 }
  0x15   :  { %p577_p9 = scmp.lt.u32.totalorder %s573_s19, %s743_s5 }
  0x17   :  { %p579_p10 = pnand %p577_p9, %p574_p8 }
  0x19   :  { %582 = shalt.err (!%p579_p10)
}
  0x1a   :  { %s583_s24 = scalar_lea.vmem %s41_s16, 2048  ;;  %p588_p12 = scmp.lt.s32.totalorder %s41_s16, %s41_s16 }
  0x1b   :  { %p584_p11 = scmp.ne.s32.totalorder %s41_s16, %s583_s24  ;;  %p589_p13 = scmp.lt.s32.totalorder %s583_s24, %s583_s24 }
  0x1d   :  { %p590_p0 = por %p589_p13, %p588_p12 }
  0x1f   :  { %p591_p1 = pnand %p590_p0, %p584_p11 }
  0x21   :  { %594 = shalt.err (!%p591_p1)
}
  0x22   :  { %46 = dma.hbm_to_vmem [thread:$0]  %s743_s5, 2048, %s41_s16, [#allocation6], %s624_s11, %s624_s11, %s625_s12  }
  0x23   :  { %617 = dma.done.wait [#allocation3], 2048  }
  0x24   :  { %618 = vsyncadd [#allocation3], 4294965248 }
  0x25   :  { %619 = dma.done.wait [#allocation6], 2048  }
  0x26   :  { %620 = vsyncadd [#allocation6], 4294965248  ;;  %v627_v0 = vmov 0.0   ;;  %vm628_vm0 = vmmov 0   ;;  %vm68_vm1 = vcmask 1043456   ;;  %vm64_vm2 = vcmask 31744  }
  0x27   :  { %412 = vmatprep.subr.mxu0 %v627_v0  ;;  %414 = vmatprep.mubr.msk.f32.mxu0 %vm628_vm0, %v627_v0  ;;  %v56_v1 = vld [vmem:[%s739_s1] sm:$0xf]  ;;  %v156_v4 = vld [vmem:[#allocation2 + $0x8] sm:$0xff]  ;;  %v629_v6 = vmov 0.0|0.0   ;;  %v157_v7 = vld [vmem:[#allocation2 + $0x10] sm:$0xff]  ;;  %s630_s8 = smov [#allocation7]  }
  0x28   :  { %449 = vmatprep.mubr.msk.f32.mxu1 %vm628_vm0, %v627_v0  ;;  %v55_v2 = vld [vmem:[%s738_s0] sm:$0xff]  ;;  %413 = vmatpush3.msk.msra.mxu0 %vm68_vm1, %v56_v1  ;;  %v158_v8 = vld [vmem:[#allocation2 + $0x18] sm:$0xff]  ;;  %v160_v11 = vld [vmem:[#allocation2 + $0x28] sm:$0xff]  ;;  %s361_s9 = sshll.u32 %s630_s8, 4  ;;  %s362_s9 = int_to_ptr.vmem [resolvable:$true] %s361_s9 }
  0x29   :  { %415 = vmatmul.mubr.msk.f32.vlgmr.msra.gmra.mrb[0].mxu0 %vm64_vm2, %v55_v2  ;;  %v155_v3 = vld [vmem:[#allocation2] sm:$0xff]  ;;  %487 = vmatprep.subr.bf16.mxu1 %v629_v6  ;;  %v491_v9 = vpack.c.bf16 %v158_v8, %v157_v7  ;;  %v161_v13 = vld [vmem:[#allocation2 + $0x30] sm:$0xff]  ;;  %v162_v14 = vld [vmem:[#allocation2 + $0x38] sm:$0xff]  ;;  %s595_s10 = scalar_lea.vmem %s362_s9, 128  ;;  %p600_p3 = scmp.lt.s32.totalorder %s362_s9, %s362_s9 }
  0x2a   :  { %484 = vmatprep.mubr.msk.f32.mxu0 %vm628_vm0, %v627_v0  ;;  %v488_v5 = vpack.c.bf16 %v156_v4, %v155_v3  ;;  %511 = vmatprep.subr.bf16.mxu0 %v629_v6  ;;  %v159_v10 = vld [vmem:[#allocation2 + $0x20] sm:$0xff]  ;;  %v497_v15 = vpack.c.bf16 %v162_v14, %v161_v13  ;;  %v164_v17 = vld [vmem:[#allocation2 + $0x48] sm:$0xff]  ;;  %v165_v19 = vld [vmem:[#allocation2 + $0x50] sm:$0xff]  ;;  %p596_p2 = scmp.ne.s32.totalorder %s362_s9, %s595_s10  ;;  %p601_p4 = scmp.lt.s32.totalorder %s595_s10, %s595_s10 }
  0x2b   :  { %v494_v12 = vpack.c.bf16 %v160_v11, %v159_v10  ;;  %v163_v16 = vld [vmem:[#allocation2 + $0x40] sm:$0xff]  ;;  %v166_v20 = vld [vmem:[#allocation2 + $0x58] sm:$0xff]  ;;  %v168_v23 = vld [vmem:[#allocation2 + $0x68] sm:$0xff] }
  0x2c   :  { %489 = vmatpush3.bf16.msra.mxu1 %v488_v5  ;;  %v500_v18 = vpack.c.bf16 %v164_v17, %v163_v16  ;;  %v503_v21 = vpack.c.bf16 %v166_v20, %v165_v19  ;;  %v167_v22 = vld [vmem:[#allocation2 + $0x60] sm:$0xff]  ;;  %v169_v25 = vld [vmem:[#allocation2 + $0x70] sm:$0xff]  ;;  %v170_v26 = vld [vmem:[#allocation2 + $0x78] sm:$0xff]  ;;  %p602_p5 = por %p601_p4, %p600_p3 }
  0x2d   :  { %490 = vmatprep.subr.bf16.mxu1 %v629_v6  ;;  %v506_v24 = vpack.c.bf16 %v168_v23, %v167_v22  ;;  %v509_v27 = vpack.c.bf16 %v170_v26, %v169_v25  ;;  %v371_v28 = vld [vmem:[%s740_s2] ss:$0 sm:$0xff]  ;;  %v262_v44 = vld [vmem:[#allocation5 + $0x8] sm:$0xff]  ;;  %v263_v46 = vld [vmem:[#allocation5 + $0x10] sm:$0xff] }
  0x2e   :  { %v261_v43 = vld [vmem:[#allocation5] sm:$0xff]  ;;  %v264_v47 = vld [vmem:[#allocation5 + $0x18] sm:$0xff]  ;;  %v266_v50 = vld [vmem:[#allocation5 + $0x28] sm:$0xff]  ;;  %p603_p6 = pnand %p602_p5, %p596_p2 }
  0x2f   :  { %v512_v45 = vpack.c.bf16 %v262_v44, %v261_v43  ;;  %v515_v48 = vpack.c.bf16 %v264_v47, %v263_v46  ;;  %v265_v49 = vld [vmem:[#allocation5 + $0x20] sm:$0xff]  ;;  %v267_v52 = vld [vmem:[#allocation5 + $0x30] sm:$0xff]  ;;  %v268_v53 = vld [vmem:[#allocation5 + $0x38] sm:$0xff] }
  0x30   :  { %492 = vmatpush3.bf16.msra.mxu1 %v491_v9  ;;  %v518_v51 = vpack.c.bf16 %v266_v50, %v265_v49  ;;  %v521_v54 = vpack.c.bf16 %v268_v53, %v267_v52  ;;  %v269_v55 = vld [vmem:[#allocation5 + $0x40] sm:$0xff]  ;;  %v270_v56 = vld [vmem:[#allocation5 + $0x48] sm:$0xff]  ;;  %v271_v58 = vld [vmem:[#allocation5 + $0x50] sm:$0xff] }
  0x31   :  { %493 = vmatprep.subr.bf16.mxu1 %v629_v6  ;;  %513 = vmatpush3.bf16.msra.mxu0 %v512_v45  ;;  %v524_v57 = vpack.c.bf16 %v270_v56, %v269_v55  ;;  %v272_v59 = vld [vmem:[#allocation5 + $0x58] sm:$0xff]  ;;  %v273_v61 = vld [vmem:[#allocation5 + $0x60] sm:$0xff]  ;;  %v274_v62 = vld [vmem:[#allocation5 + $0x68] sm:$0xff] }
  0x32   :  { %514 = vmatprep.subr.bf16.mxu0 %v629_v6  ;;  %v527_v60 = vpack.c.bf16 %v272_v59, %v271_v58  ;;  %v530_v63 = vpack.c.bf16 %v274_v62, %v273_v61  ;;  %v275_v0 = vld [vmem:[#allocation5 + $0x70] sm:$0xff]  ;;  %v276_v1 = vld [vmem:[#allocation5 + $0x78] sm:$0xff]  ;;  %v374_v3 = vld [vmem:[%s742_s4] ss:$0 sm:$0xff] }
  0x33   :  { %v533_v2 = vpack.c.bf16 %v276_v1, %v275_v0 }
  0x34   :  { %495 = vmatpush3.bf16.msra.mxu1 %v494_v12 }
  0x35   :  { %496 = vmatprep.subr.bf16.mxu1 %v629_v6  ;;  %516 = vmatpush3.bf16.msra.mxu0 %v515_v48 }
  0x36   :  { %517 = vmatprep.subr.bf16.mxu0 %v629_v6 }
  0x38   :  { %498 = vmatpush3.bf16.msra.mxu1 %v497_v15 }
  0x39   :  { %499 = vmatprep.subr.bf16.mxu1 %v629_v6  ;;  %519 = vmatpush3.bf16.msra.mxu0 %v518_v51 }
  0x3a   :  { %520 = vmatprep.subr.bf16.mxu0 %v629_v6 }
  0x3c   :  { %501 = vmatpush3.bf16.msra.mxu1 %v500_v18  ;;  %v375_v18 = vld [vmem:[%s744_s6] ss:$0 sm:$0xff] }
  0x3d   :  { %502 = vmatprep.subr.bf16.mxu1 %v629_v6  ;;  %522 = vmatpush3.bf16.msra.mxu0 %v521_v54 }
  0x3e   :  { %523 = vmatprep.subr.bf16.mxu0 %v629_v6 }
  0x40   :  { %504 = vmatpush3.bf16.msra.mxu1 %v503_v21 }
  0x41   :  { %505 = vmatprep.subr.bf16.mxu1 %v629_v6  ;;  %525 = vmatpush3.bf16.msra.mxu0 %v524_v57 }
  0x42   :  { %526 = vmatprep.subr.bf16.mxu0 %v629_v6 }
  0x44   :  { %507 = vmatpush3.bf16.msra.mxu1 %v506_v24 }
  0x45   :  { %508 = vmatprep.subr.bf16.mxu1 %v629_v6  ;;  %528 = vmatpush3.bf16.msra.mxu0 %v527_v60 }
  0x46   :  { %529 = vmatprep.subr.bf16.mxu0 %v629_v6 }
  0x48   :  { %510 = vmatpush3.bf16.msra.mxu1 %v509_v27 }
  0x49   :  { %531 = vmatpush3.bf16.msra.mxu0 %v530_v63 }
  0x4a   :  { %532 = vmatprep.subr.bf16.mxu0 %v629_v6 }
  0x4d   :  { %534 = vmatpush3.bf16.msra.mxu0 %v533_v2 }
  0xfc   :  { %v138_v29 = vpop.f32.mrb[0].mxu0 }
  0xfd   :  { %v139_v30 = vadd.f32 %v371_v28, %v138_v29  ;;  %v416_v31 = vpop.f32.mrb[1].mxu0 }
  0xff   :  { %v143_v32 = vmul.f32 1.442695, %v139_v30  ;;  %vm142_vm4 = vcmp.gt.f32.partialorder %v139_v30, 20.0 }
 0x101   :  { %543 = vpow2.f32 %v143_v32 }
 0x10b   :  { %v544_v33 = vpop.eup %543 }
 0x10c   :  { %v145_v34 = vadd.f32 1.0, %v544_v33  ;;  %v148_v35 = vmul.f32 -0.5, %v544_v33  ;;  %v151_v37 = vand.u32 2147483647, %v544_v33 }
 0x10e   :  { %545 = vlog2.f32 %v145_v34  ;;  %v149_v36 = vadd.f32 1.0, %v148_v35  ;;  %vm152_vm3 = vcmp.lt.f32.partialorder %v151_v37, 0.0004427343 }
 0x110   :  { %v150_v40 = vmul.f32 %v544_v33, %v149_v36 }
 0x118   :  { %v546_v38 = vpop.eup %545 }
 0x119   :  { %v147_v39 = vmul.f32 0.6931472, %v546_v38 }
 0x11b   :  { %v153_v41 = vsel %vm152_vm3, %v150_v40, %v147_v39 }
 0x11c   :  { %v154_v42 = vsel %vm142_vm4, %v139_v30, %v153_v41 }
 0x11d   :  { %450 = vmatmul.mubr.f32.vlgmr.msra.gmra.mrb[0].mxu1 %v154_v42 }
 0x1f0   :  { %v244_v4 = vpop.f32.mrb[0].mxu1 }
 0x1f1   :  { %v245_v5 = vadd.f32 %v374_v3, %v244_v4  ;;  %v451_v7 = vpop.f32.mrb[1].mxu1 }
 0x1f3   :  { %v249_v8 = vmul.f32 1.442695, %v245_v5  ;;  %vm248_vm6 = vcmp.gt.f32.partialorder %v245_v5, 20.0 }
 0x1f5   :  { %547 = vpow2.f32 %v249_v8 }
 0x1ff   :  { %v548_v9 = vpop.eup %547 }
 0x200   :  { %v251_v10 = vadd.f32 1.0, %v548_v9  ;;  %v254_v11 = vmul.f32 -0.5, %v548_v9  ;;  %v257_v13 = vand.u32 2147483647, %v548_v9 }
 0x202   :  { %549 = vlog2.f32 %v251_v10  ;;  %v255_v12 = vadd.f32 1.0, %v254_v11  ;;  %vm258_vm5 = vcmp.lt.f32.partialorder %v257_v13, 0.0004427343 }
 0x204   :  { %v256_v16 = vmul.f32 %v548_v9, %v255_v12 }
 0x20c   :  { %v550_v14 = vpop.eup %549 }
 0x20d   :  { %v253_v15 = vmul.f32 0.6931472, %v550_v14 }
 0x20f   :  { %v259_v6 = vsel %vm258_vm5, %v256_v16, %v253_v15 }
 0x210   :  { %v260_v17 = vsel %vm248_vm6, %v245_v5, %v259_v6 }
 0x211   :  { %485 = vmatmul.mubr.f32.vlgmr.msra.gmra.mrb[2].mxu0 %v260_v17 }
 0x2e4   :  { %v350_v19 = vpop.f32.mrb[2].mxu0 }
 0x2e5   :  { %v351_v20 = vadd.f32 %v375_v18, %v350_v19  ;;  %v486_v21 = vpop.f32.mrb[3].mxu0 }
 0x2e7   :  { %354 = vst [vmem:[#allocation7] sm:$0xff] %v351_v20 }
 0x2e8   :  { %606 = shalt.err (!%p603_p6)
}
 0x2e9   :  { %s607_s13 = scalar_lea.hbm %s745_s7, 128 }
 0x2ea   :  { %p608_p7 = scmp.ne.s32.totalorder %s745_s7, %s607_s13  ;;  %p611_p8 = scmp.lt.u32.totalorder %s607_s13, %s745_s7 }
 0x2ec   :  { %p613_p9 = pnand %p611_p8, %p608_p7 }
 0x2ee   :  { %616 = shalt.err (!%p613_p9)
}
 0x2ef   :  { %364 = dma.vmem_to_hbm [thread:$0]  %s362_s9, 128, %s745_s7, [#allocation4]  }
 0x2f0   :  { %621 = dma.done.wait [#allocation4], 128  }
 0x2f1   :  { %622 = vsyncadd [#allocation4], 4294967168 }
 0x2f2   :  { %368 = vsyncpa [#allocation3], 1 }
 0x2f3   :  { %369 = vsyncpa [#allocation6], 1 }
 0x2f4   :  { %370 = vsyncpa [#allocation4], 1 }

</bundles_post_ra>
